<compile_context>
chip_gen: v5e
topology: v5e:2x2
jax: 0.10.0
libtpu: 0.0.40
codegen_flags: <defaults>
</compile_context>

<pallas_src>
import functools

import jax
import jax.numpy as jnp
from jax.experimental import pallas as pl
from jax.experimental.pallas import tpu as pltpu

LANE = 128


def _round_up(v, m):
    return ((v + m - 1) // m) * m


def _pad2(x, rows, cols):
    return jnp.pad(x, ((0, rows - x.shape[0]), (0, cols - x.shape[1])))


# ----------------------------- Pallas kernel --------------------------------
def gcn_layer_kernel(a_ref, x_ref, w_ref, b_ref, out_ref, acc_ref, *, apply_relu):
    """One GCN layer: out = act((A @ X) @ W + b), tiled over (rows, k)."""
    k = pl.program_id(1)

    @pl.when(k == 0)
    def _():
        acc_ref[...] = jnp.zeros_like(acc_ref)

    # Accumulate the N-reduction of A @ X in f32 (bf16 inputs, MXU accumulate).
    acc_ref[...] += jnp.dot(
        a_ref[...], x_ref[...], preferred_element_type=jnp.float32
    )

    @pl.when(k == pl.num_programs(1) - 1)
    def _():
        # Small (tm, Fpad) @ (Fpad, Cpad) weight matmul + bias + activation,
        # done once per output row-tile (hoisted out of the k loop).
        h = jnp.dot(
            acc_ref[...].astype(w_ref.dtype),
            w_ref[...],
            preferred_element_type=jnp.float32,
        )
        h = h + b_ref[...]
        if apply_relu:
            h = jnp.maximum(h, 0.0)
        out_ref[...] = h.astype(out_ref.dtype)


def gcn_layer_pallas(a, x, w_t, b, *, apply_relu, out_dtype, tm, tk):
    """a: [Np, Np] bf16, x: [Np, Fp] bf16, w_t: [Fp, Cp] bf16 (pre-transposed),
    b: [1, Cp] f32.  Np % tm == Np % tk == 0, Fp/Cp multiples of 128."""
    n_p = a.shape[0]
    f_p = x.shape[1]
    c_p = w_t.shape[1]
    grid = (n_p // tm, n_p // tk)

    kernel = functools.partial(gcn_layer_kernel, apply_relu=apply_relu)
    return pl.pallas_call(
        kernel,
        out_shape=jax.ShapeDtypeStruct((n_p, c_p), out_dtype),
        grid_spec=pltpu.PrefetchScalarGridSpec(
            num_scalar_prefetch=0,
            grid=grid,
            in_specs=[
                pl.BlockSpec((tm, tk), lambda i, k: (i, k)),    # A tile
                pl.BlockSpec((tk, f_p), lambda i, k: (k, 0)),   # X row-slab
                pl.BlockSpec((f_p, c_p), lambda i, k: (0, 0)),  # W (resident)
                pl.BlockSpec((1, c_p), lambda i, k: (0, 0)),    # bias (resident)
            ],
            out_specs=pl.BlockSpec((tm, c_p), lambda i, k: (i, 0)),
            scratch_shapes=[pltpu.VMEM((tm, f_p), jnp.float32)],
        ),
        compiler_params=pltpu.CompilerParams(
            dimension_semantics=("parallel", "arbitrary"),
        ),
    )(a, x, w_t, b)


# ------------------------------ JAX glue -------------------------------------
def build_norm_adj(edge_index, num_nodes):
    """Dense D^{-1/2} (A + I) D^{-1/2} matching torch_geometric gcn_norm."""
    src = edge_index[0]
    dst = edge_index[1]
    loops = jnp.arange(num_nodes, dtype=src.dtype)
    src = jnp.concatenate([src, loops])
    dst = jnp.concatenate([dst, loops])
    a = jnp.zeros((num_nodes, num_nodes), jnp.float32).at[dst, src].add(1.0)
    deg = jnp.zeros((num_nodes,), jnp.float32).at[dst].add(1.0)
    dinv = jnp.where(deg > 0, jax.lax.rsqrt(deg), 0.0)
    return dinv[:, None] * a * dinv[None, :]


def glorot(key, shape):
    fan_in, fan_out = shape[1], shape[0]
    limit = (6.0 / (fan_in + fan_out)) ** 0.5
    return jax.random.uniform(key, shape, jnp.float32, -limit, limit)


def init_gcn_encoder_params(key, n_dim, n_latent):
    k1, k2 = jax.random.split(key)
    # GCNConv linear weights are [out_features, in_features]; bias after propagate.
    w1 = glorot(k1, (n_latent * 2, n_dim))
    b1 = jnp.zeros((1, n_latent * 2), jnp.float32)
    w2 = glorot(k2, (n_latent, n_latent * 2))
    b2 = jnp.zeros((1, n_latent), jnp.float32)
    return w1, b1, w2, b2


def _pick_tiles(n, tm_max=256, tk_max=256):
    """Lane/sublane-legal tile sizes: multiples of 128, no bigger than needed."""
    n_lane = _round_up(n, LANE)
    tm = min(tm_max, n_lane)
    tk = min(tk_max, n_lane)
    n_p = _round_up(n, max(tm, tk))
    return n_p, tm, tk


def gcn_encoder_forward(x, edge_index, params, *, tm=256, tk=256):
    w1, b1, w2, b2 = params
    n, n_dim = x.shape
    n_hidden = w1.shape[0]   # 2 * n_latent
    n_latent = w2.shape[0]

    a_norm = build_norm_adj(edge_index, n)

    # Pad node count to tile multiple, feature dims to lane width (128).
    n_p, tm, tk = _pick_tiles(n, tm, tk)
    f_p = _round_up(n_dim, LANE)
    c1_p = _round_up(n_hidden, LANE)
    c2_p = _round_up(n_latent, LANE)

    a_p = _pad2(a_norm, n_p, n_p).astype(jnp.bfloat16)
    x_p = _pad2(x, n_p, f_p).astype(jnp.bfloat16)
    w1_t = _pad2(w1.T, f_p, c1_p).astype(jnp.bfloat16)    # [in, out], padded
    b1_p = _pad2(b1, 1, c1_p).astype(jnp.float32)
    w2_t = _pad2(w2.T, c1_p, c2_p).astype(jnp.bfloat16)
    b2_p = _pad2(b2, 1, c2_p).astype(jnp.float32)

    # Layer 1: relu(A @ X @ W1 + b1), bf16 activations feed layer 2.
    h1 = gcn_layer_pallas(
        a_p, x_p, w1_t, b1_p, apply_relu=True, out_dtype=jnp.bfloat16, tm=tm, tk=tk
    )
    # Layer 2: A @ h1 @ W2 + b2, f32 result.
    h2 = gcn_layer_pallas(
        a_p, h1, w2_t, b2_p, apply_relu=False, out_dtype=jnp.float32, tm=tm, tk=tk
    )
    return h2[:n, :n_latent]


def gcn_encoder_reference(x, edge_index, params):
    """Pure-JAX f32 reference with PyG GCNConv semantics."""
    w1, b1, w2, b2 = params
    a = build_norm_adj(edge_index, x.shape[0])
    h1 = jnp.maximum(a @ (x @ w1.T) + b1, 0.0)
    return a @ (h1 @ w2.T) + b2


# ------------------------------ main -----------------------------------------
if __name__ == "__main__":
    key = jax.random.PRNGKey(0)
    k_x, k_p = jax.random.split(key)

    num_nodes = 16
    n_dim = 4
    n_latent = 8

    # Deterministic node features.
    x = jax.random.normal(k_x, (num_nodes, n_dim), jnp.float32)

    # Deterministic small undirected ring graph: edges i <-> i+1.
    src = jnp.arange(num_nodes, dtype=jnp.int32)
    dst = (src + 1) % num_nodes
    edge_index = jnp.stack(
        [jnp.concatenate([src, dst]), jnp.concatenate([dst, src])], axis=0
    )  # [2, 2*num_nodes]

    params = init_gcn_encoder_params(k_p, n_dim, n_latent)

    out = gcn_encoder_forward(x, edge_index, params)
    out = jax.block_until_ready(out)
    assert out.shape == (num_nodes, n_latent)

    # Loose tolerance: kernel uses bf16 inputs with f32 accumulation.
    ref = gcn_encoder_reference(x, edge_index, params)
    assert jnp.allclose(out, ref, atol=1e-1, rtol=1e-1), float(
        jnp.max(jnp.abs(out - ref))
    )

    print("KERNEL_OK")
</pallas_src>

<mosaic_0001>
module attributes {stable_mosaic.version = 11 : i64} {
  func.func @gcn_layer_kernel(%arg0: i32, %arg1: i32, %arg2: memref<128x128xbf16, #tpu.memory_space<vmem>>, %arg3: memref<128x128xbf16, #tpu.memory_space<vmem>>, %arg4: memref<128x128xbf16, #tpu.memory_space<vmem>>, %arg5: memref<1x128xf32, #tpu.memory_space<vmem>>, %arg6: memref<128x128xbf16, #tpu.memory_space<vmem>>, %arg7: memref<128x128xf32, #tpu.memory_space<vmem>>) attributes {dimension_semantics = [#tpu.dimension_semantics<parallel>, #tpu.dimension_semantics<arbitrary>], iteration_bounds = array<i64: 1, 1>, scalar_prefetch = 0 : i64, scratch_operands = 1 : i64, tpu.core_type = #tpu.core_type<tc>, window_params = [{transform_indices = @transform_0, window_bounds = array<i64: 128, 128>}, {transform_indices = @transform_1, window_bounds = array<i64: 128, 128>}, {pipeline_mode = #tpu.pipeline_mode<synchronous>, transform_indices = @transform_2, window_bounds = array<i64: 128, 128>}, {pipeline_mode = #tpu.pipeline_mode<synchronous>, transform_indices = @transform_3, window_bounds = array<i64: 1, 128>}, {transform_indices = @transform_4, window_bounds = array<i64: 128, 128>}]} {
    %c0_i32 = arith.constant 0 : i32
    %0 = arith.cmpi eq, %arg1, %c0_i32 : i32
    %1 = arith.extui %0 : i1 to i32
    %c0_i32_0 = arith.constant 0 : i32
    %2 = arith.cmpi ne, %1, %c0_i32_0 : i32
    scf.if %2 {
      %cst_10 = arith.constant 0.000000e+00 : f32
      %12 = vector.broadcast %cst_10 : f32 to vector<128x128xf32>
      %c0_11 = arith.constant 0 : index
      %c0_12 = arith.constant 0 : index
      %13 = vector.load %arg7[%c0_11, %c0_12] : memref<128x128xf32, #tpu.memory_space<vmem>>, vector<128x128xf32>
      tpu.vector_store %arg7[%c0_11, %c0_12], %12 {strides = array<i32>} : memref<128x128xf32, #tpu.memory_space<vmem>>, vector<128x128xf32>,
    } else {
    }
    %c0 = arith.constant 0 : index
    %c0_1 = arith.constant 0 : index
    %3 = vector.load %arg7[%c0, %c0_1] : memref<128x128xf32, #tpu.memory_space<vmem>>, vector<128x128xf32>
    %c0_2 = arith.constant 0 : index
    %c0_3 = arith.constant 0 : index
    %4 = vector.load %arg2[%c0_2, %c0_3] : memref<128x128xbf16, #tpu.memory_space<vmem>>, vector<128x128xbf16>
    %c0_4 = arith.constant 0 : index
    %c0_5 = arith.constant 0 : index
    %5 = vector.load %arg3[%c0_4, %c0_5] : memref<128x128xbf16, #tpu.memory_space<vmem>>, vector<128x128xbf16>
    %cst = arith.constant dense<0.000000e+00> : vector<128x128xf32>
    %6 = tpu.matmul %4, %5, %cst {dimension_numbers = #tpu.dot_dimension_numbers<[1], [0], [0], [1], [0, 0, 1, 1], [], []>} : vector<128x128xbf16>, vector<128x128xbf16>, vector<128x128xf32> -> vector<128x128xf32>
    %7 = arith.addf %3, %6 : vector<128x128xf32>
    %c0_6 = arith.constant 0 : index
    %c0_7 = arith.constant 0 : index
    %8 = vector.load %arg7[%c0_6, %c0_7] : memref<128x128xf32, #tpu.memory_space<vmem>>, vector<128x128xf32>
    tpu.vector_store %arg7[%c0_6, %c0_7], %7 {strides = array<i32>} : memref<128x128xf32, #tpu.memory_space<vmem>>, vector<128x128xf32>,
    %c0_i32_8 = arith.constant 0 : i32
    %9 = arith.cmpi eq, %arg1, %c0_i32_8 : i32
    %10 = arith.extui %9 : i1 to i32
    %c0_i32_9 = arith.constant 0 : i32
    %11 = arith.cmpi ne, %10, %c0_i32_9 : i32
    scf.if %11 {
      %c0_10 = arith.constant 0 : index
      %c0_11 = arith.constant 0 : index
      %12 = vector.load %arg7[%c0_10, %c0_11] : memref<128x128xf32, #tpu.memory_space<vmem>>, vector<128x128xf32>
      %13 = arith.truncf %12 : vector<128x128xf32> to vector<128x128xbf16>
      %c0_12 = arith.constant 0 : index
      %c0_13 = arith.constant 0 : index
      %14 = vector.load %arg4[%c0_12, %c0_13] : memref<128x128xbf16, #tpu.memory_space<vmem>>, vector<128x128xbf16>
      %cst_14 = arith.constant dense<0.000000e+00> : vector<128x128xf32>
      %15 = tpu.matmul %13, %14, %cst_14 {dimension_numbers = #tpu.dot_dimension_numbers<[1], [0], [0], [1], [0, 0, 1, 1], [], []>} : vector<128x128xbf16>, vector<128x128xbf16>, vector<128x128xf32> -> vector<128x128xf32>
      %c0_15 = arith.constant 0 : index
      %c0_16 = arith.constant 0 : index
      %16 = vector.load %arg5[%c0_15, %c0_16] : memref<1x128xf32, #tpu.memory_space<vmem>>, vector<1x128xf32>
      %17 = vector.broadcast %16 : vector<1x128xf32> to vector<128x128xf32>
      %18 = arith.addf %15, %17 : vector<128x128xf32>
      %cst_17 = arith.constant 0.000000e+00 : f32
      %19 = vector.broadcast %cst_17 : f32 to vector<128x128xf32>
      %20 = arith.maximumf %18, %19 : vector<128x128xf32>
      %21 = arith.truncf %20 : vector<128x128xf32> to vector<128x128xbf16>
      %c0_18 = arith.constant 0 : index
      %c0_19 = arith.constant 0 : index
      %22 = vector.load %arg6[%c0_18, %c0_19] : memref<128x128xbf16, #tpu.memory_space<vmem>>, vector<128x128xbf16>
      tpu.vector_store %arg6[%c0_18, %c0_19], %21 {strides = array<i32>} : memref<128x128xbf16, #tpu.memory_space<vmem>>, vector<128x128xbf16>,
    } else {
    }
    return
  }
  func.func @transform_0(%arg0: i32, %arg1: i32) -> (i32, i32) {
    %c0_i32 = arith.constant 0 : i32
    return %arg0, %arg1 : i32, i32
  }
  func.func @transform_1(%arg0: i32, %arg1: i32) -> (i32, i32) {
    %c0_i32 = arith.constant 0 : i32
    %c0_i32_0 = arith.constant 0 : i32
    return %arg1, %c0_i32 : i32, i32
  }
  func.func @transform_2(%arg0: i32, %arg1: i32) -> (i32, i32) {
    %c0_i32 = arith.constant 0 : i32
    %c0_i32_0 = arith.constant 0 : i32
    %c0_i32_1 = arith.constant 0 : i32
    return %c0_i32, %c0_i32_0 : i32, i32
  }
  func.func @transform_3(%arg0: i32, %arg1: i32) -> (i32, i32) {
    %c0_i32 = arith.constant 0 : i32
    %c0_i32_0 = arith.constant 0 : i32
    %c0_i32_1 = arith.constant 0 : i32
    return %c0_i32, %c0_i32_0 : i32, i32
  }
  func.func @transform_4(%arg0: i32, %arg1: i32) -> (i32, i32) {
    %c0_i32 = arith.constant 0 : i32
    %c0_i32_0 = arith.constant 0 : i32
    return %arg0, %c0_i32 : i32, i32
  }
}

</mosaic_0001>

<bundles_post_ra>
// kernel: tpu_custom_call.1
= control target key start
LH: loop header
LB: loop body
LE: loop exit
PB: predicated region body
PF: predicated region fallthrough
CT: control target
= control target key end

     0   :  { %9 = vsyncpa [#allocation4], 0  ;;  %s872_s0 = inlined_call_operand.hbm [shape: bf16[128,128], index: 0, kind: input, shape index: {}]   ;;  %s873_s1 = inlined_call_operand.hbm [shape: bf16[128,128], index: 1, kind: input, shape index: {}]   ;;  %s874_s2 = inlined_call_operand.hbm [shape: bf16[128,128], index: 2, kind: input, shape index: {}]   ;;  %s875_s3 = inlined_call_operand.vmem [shape: f32[1,128], index: 3, kind: input, shape index: {}]   ;;  %s876_s4 = inlined_call_operand.hbm [shape: bf16[128,128], index: 4, kind: output, shape index: {}]  }
   0x1   :  { %10 = vsyncpa [#allocation7], 0 }
   0x2   :  { %11 = vsyncpa [#allocation5], 0  ;;  %s29_s17 = sshll.u32 %s873_s1, 4  ;;  %s814_s18 = smov [#allocation6]   ;;  %s30_s17 = int_to_ptr.hbm [resolvable:$true] %s29_s17 }
   0x3   :  { %s31_s19 = sshll.u32 %s814_s18, 4  ;;  %s16_s22 = sshll.u32 %s872_s0, 4  ;;  %s32_s19 = int_to_ptr.vmem [resolvable:$true] %s31_s19  ;;  %s17_s22 = int_to_ptr.hbm [resolvable:$true] %s16_s22 }
   0x4   :  { %s815_s23 = smov 64   ;;  %s816_s24 = smov 4  }
   0x5   :  { %37 = dma.hbm_to_vmem [thread:$0]  %s30_s17, 1024, %s32_s19, [#allocation7], %s815_s23, %s815_s23, %s816_s24  }
   0x6   :  { %s817_s25 = smov [#allocation3]   ;;  %s42_s1 = sshll.u32 %s874_s2, 4  ;;  %s43_s1 = int_to_ptr.hbm [resolvable:$true] %s42_s1 }
   0x7   :  { %s18_s26 = sshll.u32 %s817_s25, 4  ;;  %s818_s0 = smov [#allocation8]   ;;  %s19_s26 = int_to_ptr.vmem [resolvable:$true] %s18_s26 }
   0x8   :  { %24 = dma.hbm_to_vmem [thread:$0]  %s17_s22, 1024, %s19_s26, [#allocation4], %s815_s23, %s815_s23, %s816_s24  }
   0x9   :  { %s44_s29 = sshll.u32 %s818_s0, 4  ;;  %s45_s29 = int_to_ptr.vmem [resolvable:$true] %s44_s29 }
   0xa   :  { %50 = dma.hbm_to_vmem [thread:$0]  %s43_s1, 1024, %s45_s29, [#allocation7], %s815_s23, %s815_s23, %s816_s24  }
   0xb   :  { %808 = dma.done.wait [#allocation4], 1024  }
   0xc   :  { %809 = vsyncadd [#allocation4], 4294966272 }
   0xd   :  { %810 = dma.done.wait [#allocation7], 2048  }
   0xe   :  { %811 = vsyncadd [#allocation7], 4294965248  ;;  %v633_v0 = vld [vmem:[#allocation6 + $0x38] sm:$0xff]  ;;  %v632_v1 = vld [vmem:[#allocation6 + $0x30] sm:$0xff]  ;;  %s508_s8 = sshll.u32 %s876_s4, 4  ;;  %s509_s8 = int_to_ptr.hbm [resolvable:$true] %s508_s8 }
   0xf   :  { %229 = vmatpush.bf16.msra.mxu0 %v633_v0  ;;  %689 = vmatpush.bf16.msra.mxu2 %v633_v0  ;;  %v631_v2 = vld [vmem:[#allocation6 + $0x28] sm:$0xff]  ;;  %v630_v3 = vld [vmem:[#allocation6 + $0x20] sm:$0xff]  ;;  %v629_v4 = vld [vmem:[#allocation6 + $0x18] sm:$0xff] }
  0x10   :  { %v628_v5 = vld [vmem:[#allocation6 + $0x10] sm:$0xff]  ;;  %v627_v6 = vld [vmem:[#allocation6 + $0x8] sm:$0xff]  ;;  %v626_v7 = vld [vmem:[#allocation6] sm:$0xff] }
  0x11   :  { %v618_v8 = vld [vmem:[#allocation3] sm:$0xff]  ;;  %v619_v10 = vld [vmem:[#allocation3 + $0x8] sm:$0xff]  ;;  %v641_v12 = vld [vmem:[#allocation8 + $0x38] sm:$0xff] }
  0x12   :  { %v622_v9 = vld [vmem:[#allocation3 + $0x20] sm:$0xff]  ;;  %v623_v11 = vld [vmem:[#allocation3 + $0x28] sm:$0xff]  ;;  %405 = vmatpush.bf16.msra.mxu1 %v641_v12  ;;  %v640_v13 = vld [vmem:[#allocation8 + $0x30] sm:$0xff]  ;;  %697 = vmatpush.bf16.msra.mxu3 %v641_v12 }
  0x13   :  { %230 = vmatpush.bf16.msra.mxu0 %v632_v1  ;;  %690 = vmatpush.bf16.msra.mxu2 %v632_v1  ;;  %v639_v14 = vld [vmem:[#allocation8 + $0x28] sm:$0xff]  ;;  %v638_v15 = vld [vmem:[#allocation8 + $0x20] sm:$0xff]  ;;  %v620_v16 = vld [vmem:[#allocation3 + $0x10] sm:$0xff] }
  0x14   :  { %v624_v17 = vld [vmem:[#allocation3 + $0x30] sm:$0xff]  ;;  %v637_v18 = vld [vmem:[#allocation8 + $0x18] sm:$0xff]  ;;  %v635_v22 = vld [vmem:[#allocation8 + $0x8] sm:$0xff] }
  0x15   :  { %v621_v19 = vld [vmem:[#allocation3 + $0x18] sm:$0xff]  ;;  %v636_v21 = vld [vmem:[#allocation8 + $0x10] sm:$0xff]  ;;  %v634_v23 = vld [vmem:[#allocation8] sm:$0xff] }
  0x16   :  { %406 = vmatpush.bf16.msra.mxu1 %v640_v13  ;;  %698 = vmatpush.bf16.msra.mxu3 %v640_v13  ;;  %v625_v20 = vld [vmem:[#allocation3 + $0x38] sm:$0xff]  ;;  %v711_v49 = vld [vmem:[%s875_s3] ss:$0 sm:$0xff]  ;;  %s819_s3 = smov [#allocation9]  }
  0x17   :  { %231 = vmatpush.bf16.msra.mxu0 %v631_v2  ;;  %691 = vmatpush.bf16.msra.mxu2 %v631_v2  ;;  %s506_s5 = sshll.u32 %s819_s3, 4  ;;  %s507_s5 = int_to_ptr.vmem [resolvable:$true] %s506_s5 }
  0x1a   :  { %407 = vmatpush.bf16.msra.mxu1 %v639_v14  ;;  %699 = vmatpush.bf16.msra.mxu3 %v639_v14 }
  0x1b   :  { %232 = vmatpush.bf16.msra.mxu0 %v630_v3  ;;  %692 = vmatpush.bf16.msra.mxu2 %v630_v3 }
  0x1e   :  { %408 = vmatpush.bf16.msra.mxu1 %v638_v15  ;;  %700 = vmatpush.bf16.msra.mxu3 %v638_v15 }
  0x1f   :  { %233 = vmatpush.bf16.msra.mxu0 %v629_v4  ;;  %693 = vmatpush.bf16.msra.mxu2 %v629_v4 }
  0x22   :  { %409 = vmatpush.bf16.msra.mxu1 %v637_v18  ;;  %701 = vmatpush.bf16.msra.mxu3 %v637_v18 }
  0x23   :  { %234 = vmatpush.bf16.msra.mxu0 %v628_v5  ;;  %694 = vmatpush.bf16.msra.mxu2 %v628_v5 }
  0x26   :  { %410 = vmatpush.bf16.msra.mxu1 %v636_v21  ;;  %702 = vmatpush.bf16.msra.mxu3 %v636_v21 }
  0x27   :  { %235 = vmatpush.bf16.msra.mxu0 %v627_v6  ;;  %695 = vmatpush.bf16.msra.mxu2 %v627_v6 }
  0x2a   :  { %411 = vmatpush.bf16.msra.mxu1 %v635_v22  ;;  %703 = vmatpush.bf16.msra.mxu3 %v635_v22 }
  0x2b   :  { %236 = vmatpush.bf16.msra.mxu0 %v626_v7  ;;  %696 = vmatpush.bf16.msra.mxu2 %v626_v7 }
  0x2e   :  { %237 = vmatmul.bf16.vlgmr.msra.gmra.mxu0 %v618_v8  ;;  %257 = vmatmul.bf16.vlgmr.msra.gmra.mxu2 %v622_v9 }
  0x2f   :  { %412 = vmatpush.bf16.msra.mxu1 %v634_v23  ;;  %704 = vmatpush.bf16.msra.mxu3 %v634_v23 }
  0x3e   :  { %242 = vmatmul.bf16.gmra.mxu0 %v619_v10  ;;  %262 = vmatmul.bf16.gmra.mxu2 %v623_v11 }
  0x4e   :  { %247 = vmatmul.bf16.gmra.mxu0 %v620_v16  ;;  %267 = vmatmul.bf16.gmra.mxu2 %v624_v17 }
  0x5e   :  { %252 = vmatmul.bf16.gmra.mxu0 %v621_v19  ;;  %272 = vmatmul.bf16.gmra.mxu2 %v625_v20 }
  0xab   :  { %v238_v24 = vpop.f32.mrf.mxu0 }
  0xb1   :  { %v258_v25 = vpop.f32.mrf.mxu2 }
  0xb3   :  { %v240_v26 = vpop.f32.mrf.mxu0 }
  0xb4   :  { %v329_v27 = vpack.c.bf16 %v240_v26, %v238_v24 }
  0xb6   :  { %413 = vmatmul.bf16.vlgmr.msra.gmra.mxu1 %v329_v27 }
  0xb9   :  { %v260_v28 = vpop.f32.mrf.mxu2 }
  0xba   :  { %v333_v29 = vpack.c.bf16 %v260_v28, %v258_v25 }
  0xbb   :  { %v243_v30 = vpop.f32.mrf.mxu0 }
  0xbc   :  { %433 = vmatmul.bf16.vlgmr.msra.gmra.mxu3 %v333_v29 }
  0xc1   :  { %v263_v31 = vpop.f32.mrf.mxu2 }
  0xc3   :  { %v245_v32 = vpop.f32.mrf.mxu0 }
  0xc4   :  { %v330_v33 = vpack.c.bf16 %v245_v32, %v243_v30 }
  0xc6   :  { %418 = vmatmul.bf16.gmra.mxu1 %v330_v33 }
  0xc9   :  { %v265_v34 = vpop.f32.mrf.mxu2 }
  0xca   :  { %v334_v35 = vpack.c.bf16 %v265_v34, %v263_v31 }
  0xcb   :  { %v248_v36 = vpop.f32.mrf.mxu0 }
  0xcc   :  { %438 = vmatmul.bf16.gmra.mxu3 %v334_v35 }
  0xd1   :  { %v268_v37 = vpop.f32.mrf.mxu2 }
  0xd3   :  { %v250_v38 = vpop.f32.mrf.mxu0 }
  0xd4   :  { %v331_v39 = vpack.c.bf16 %v250_v38, %v248_v36 }
  0xd6   :  { %423 = vmatmul.bf16.gmra.mxu1 %v331_v39 }
  0xd9   :  { %v270_v40 = vpop.f32.mrf.mxu2 }
  0xda   :  { %v335_v41 = vpack.c.bf16 %v270_v40, %v268_v37 }
  0xdb   :  { %v253_v42 = vpop.f32.mrf.mxu0 }
  0xdc   :  { %443 = vmatmul.bf16.gmra.mxu3 %v335_v41 }
  0xe1   :  { %v273_v43 = vpop.f32.mrf.mxu2 }
  0xe3   :  { %v255_v44 = vpop.f32.mrf.mxu0 }
  0xe4   :  { %v332_v45 = vpack.c.bf16 %v255_v44, %v253_v42 }
  0xe6   :  { %428 = vmatmul.bf16.gmra.mxu1 %v332_v45 }
  0xe9   :  { %v275_v46 = vpop.f32.mrf.mxu2 }
  0xea   :  { %v336_v47 = vpack.c.bf16 %v275_v46, %v273_v43 }
  0xec   :  { %448 = vmatmul.bf16.gmra.mxu3 %v336_v47 }
 0x133   :  { %v414_v48 = vpop.f32.mrf.mxu1 }
 0x134   :  { %v415_v50 = vadd.f32 %v711_v49, %v414_v48 }
 0x136   :  { %v454_v53 = vmax.f32 %v415_v50, 0.0 }
 0x13b   :  { %v416_v51 = vpop.f32.mrf.mxu1 }
 0x13c   :  { %v417_v52 = vadd.f32 %v711_v49, %v416_v51 }
 0x13e   :  { %v455_v54 = vmax.f32 %v417_v52, 0.0 }
 0x13f   :  { %v434_v55 = vpop.f32.mrf.mxu3 }
 0x140   :  { %v645_v56 = vpack.c.bf16 %v455_v54, %v454_v53  ;;  %v435_v58 = vadd.f32 %v711_v49, %v434_v55 }
 0x142   :  { %646 = vst [vmem:[#allocation9] sm:$0xff] %v645_v56   ;;  %v462_v61 = vmax.f32 %v435_v58, 0.0 }
 0x143   :  { %v419_v57 = vpop.f32.mrf.mxu1 }
 0x144   :  { %v420_v62 = vadd.f32 %v711_v49, %v419_v57 }
 0x146   :  { %v456_v3 = vmax.f32 %v420_v62, 0.0 }
 0x147   :  { %v436_v59 = vpop.f32.mrf.mxu3 }
 0x148   :  { %v437_v60 = vadd.f32 %v711_v49, %v436_v59 }
 0x14a   :  { %v463_v63 = vmax.f32 %v437_v60, 0.0 }
 0x14b   :  { %v421_v0 = vpop.f32.mrf.mxu1 }
 0x14c   :  { %v665_v1 = vpack.c.bf16 %v463_v63, %v462_v61  ;;  %v422_v2 = vadd.f32 %v711_v49, %v421_v0 }
 0x14e   :  { %685 = vst [vmem:[#allocation9 + $0x20] sm:$0xff] %v665_v1   ;;  %v457_v4 = vmax.f32 %v422_v2, 0.0 }
 0x14f   :  { %v439_v5 = vpop.f32.mrf.mxu3 }
 0x150   :  { %v650_v6 = vpack.c.bf16 %v457_v4, %v456_v3  ;;  %v440_v8 = vadd.f32 %v711_v49, %v439_v5 }
 0x152   :  { %682 = vst [vmem:[#allocation9 + $0x8] sm:$0xff] %v650_v6   ;;  %v464_v11 = vmax.f32 %v440_v8, 0.0 }
 0x153   :  { %v424_v7 = vpop.f32.mrf.mxu1 }
 0x154   :  { %v425_v12 = vadd.f32 %v711_v49, %v424_v7 }
 0x156   :  { %v458_v17 = vmax.f32 %v425_v12, 0.0 }
 0x157   :  { %v441_v9 = vpop.f32.mrf.mxu3 }
 0x158   :  { %v442_v10 = vadd.f32 %v711_v49, %v441_v9 }
 0x15a   :  { %v465_v13 = vmax.f32 %v442_v10, 0.0 }
 0x15b   :  { %v426_v14 = vpop.f32.mrf.mxu1 }
 0x15c   :  { %v670_v15 = vpack.c.bf16 %v465_v13, %v464_v11  ;;  %v427_v16 = vadd.f32 %v711_v49, %v426_v14 }
 0x15e   :  { %686 = vst [vmem:[#allocation9 + $0x28] sm:$0xff] %v670_v15   ;;  %v459_v18 = vmax.f32 %v427_v16, 0.0 }
 0x15f   :  { %v444_v19 = vpop.f32.mrf.mxu3 }
 0x160   :  { %v655_v20 = vpack.c.bf16 %v459_v18, %v458_v17  ;;  %v445_v22 = vadd.f32 %v711_v49, %v444_v19 }
 0x162   :  { %683 = vst [vmem:[#allocation9 + $0x10] sm:$0xff] %v655_v20   ;;  %v466_v25 = vmax.f32 %v445_v22, 0.0 }
 0x163   :  { %v429_v21 = vpop.f32.mrf.mxu1 }
 0x164   :  { %v430_v26 = vadd.f32 %v711_v49, %v429_v21 }
 0x166   :  { %v460_v31 = vmax.f32 %v430_v26, 0.0 }
 0x167   :  { %v446_v23 = vpop.f32.mrf.mxu3 }
 0x168   :  { %v447_v24 = vadd.f32 %v711_v49, %v446_v23 }
 0x16a   :  { %v467_v27 = vmax.f32 %v447_v24, 0.0 }
 0x16b   :  { %v431_v28 = vpop.f32.mrf.mxu1 }
 0x16c   :  { %v675_v29 = vpack.c.bf16 %v467_v27, %v466_v25  ;;  %v432_v30 = vadd.f32 %v711_v49, %v431_v28 }
 0x16e   :  { %687 = vst [vmem:[#allocation9 + $0x30] sm:$0xff] %v675_v29   ;;  %v461_v32 = vmax.f32 %v432_v30, 0.0 }
 0x16f   :  { %v449_v33 = vpop.f32.mrf.mxu3 }
 0x170   :  { %v660_v34 = vpack.c.bf16 %v461_v32, %v460_v31  ;;  %v450_v35 = vadd.f32 %v711_v49, %v449_v33 }
 0x172   :  { %684 = vst [vmem:[#allocation9 + $0x18] sm:$0xff] %v660_v34   ;;  %v468_v38 = vmax.f32 %v450_v35, 0.0 }
 0x177   :  { %v451_v36 = vpop.f32.mrf.mxu3 }
 0x178   :  { %v452_v37 = vadd.f32 %v711_v49, %v451_v36 }
 0x17a   :  { %v469_v39 = vmax.f32 %v452_v37, 0.0 }
 0x17c   :  { %v680_v40 = vpack.c.bf16 %v469_v39, %v468_v38 }
 0x17e   :  { %688 = vst [vmem:[#allocation9 + $0x38] sm:$0xff] %v680_v40  }
 0x17f   :  { %514 = dma.vmem_to_hbm [thread:$0]  %s507_s5, 1024, %s509_s8, [#allocation5], %s815_s23, %s815_s23, %s816_s24  }
 0x180   :  { %812 = dma.done.wait [#allocation5], 1024  }
 0x181   :  { %813 = vsyncadd [#allocation5], 4294966272 }
 0x182   :  { %519 = vsyncpa [#allocation4], 1 }
 0x183   :  { %520 = vsyncpa [#allocation7], 1 }
 0x184   :  { %521 = vsyncpa [#allocation5], 1 }

</bundles_post_ra>
